<compile_context>
chip_gen: v5e
topology: v5e:2x2
jax: 0.10.0
libtpu: 0.0.40
codegen_flags: <defaults>
</compile_context>

<pallas_src>
import jax
import jax.numpy as jnp
from jax.experimental import pallas as pl
from jax.experimental.pallas import tpu as pltpu


def _round_up(x, m):
    return (x + m - 1) // m * m


def mlp_kernel(x_ref, w1_ref, b1_ref, w2_ref, b2_ref, w3_ref, b3_ref, o_ref):
    # x_ref: (tb, in_size) tile of the batch (input dtype, unpadded);
    # w*_ref: VMEM-resident compute-dtype weights; b*_ref: f32 (1, N) biases;
    # o_ref: (tb, out_size) output tile.
    x = x_ref[...].astype(w1_ref.dtype)           # cast in vregs, not in HBM

    # fc1 + ReLU: MXU matmul (f32 accumulate), bias-add/ReLU on the VPU in f32.
    h = jnp.dot(x, w1_ref[...], preferred_element_type=jnp.float32) + b1_ref[...]
    h = jnp.maximum(h, 0.0)

    # fc2 + ReLU
    h = jnp.dot(h.astype(w2_ref.dtype), w2_ref[...],
                preferred_element_type=jnp.float32) + b2_ref[...]
    h = jnp.maximum(h, 0.0)

    # nn.Dropout is identity in eval mode (inference semantics).
    # TODO(synk): training-mode dropout would need pltpu.prng_seed +
    #             pltpu.prng_random_bits masking and 1/(1-p) scaling.

    # fc3
    o_ref[...] = (jnp.dot(h.astype(w3_ref.dtype), w3_ref[...],
                          preferred_element_type=jnp.float32)
                  + b3_ref[...]).astype(o_ref.dtype)


def _vmem_capacity_bytes():
    """Physical VMEM capacity (v5e/v6e: 128 MiB, v7x: 64 MiB/TC); safe fallback."""
    try:
        cap = getattr(pltpu.get_tpu_info(), "vmem_capacity_bytes", None)
    except Exception:
        cap = None
    return int(cap) if cap else 64 * 1024 * 1024


def prepare_params(w1, b1, w2, b2, w3, b3, compute_dtype=jnp.bfloat16):
    """One-time weight cast / bias reshape, kept outside the per-call graph."""
    cast_w = lambda w: jnp.asarray(w, compute_dtype)
    cast_b = lambda b: jnp.asarray(b, jnp.float32).reshape(1, -1)
    return (cast_w(w1), cast_b(b1), cast_w(w2), cast_b(b2), cast_w(w3), cast_b(b3))


def _pick_batch_tile(batch, block_batch):
    # bf16 activations pack 16 rows per vreg -> keep tb a multiple of 16.
    tb = max(16, _round_up(min(block_batch, batch), 16))
    # Guarantee >= 2 grid steps when there is enough batch so that
    # dimension_semantics=("parallel",) can shard across v7x's two TensorCores.
    if batch > 16 and pl.cdiv(batch, tb) < 2:
        tb = max(16, _round_up(-(-batch // 2), 16))
    return tb


def _fit_tb_to_vmem(tb, in_size, hid, out_size, w_itemsize, vmem_limit_bytes):
    budget = int(vmem_limit_bytes * 0.9)
    # Resident weights/biases (single-buffered via pl.Buffered(1)).
    w_bytes = ((in_size * hid + hid * hid + hid * out_size) * w_itemsize
               + (2 * hid + out_size) * 4)
    if w_bytes > budget:
        # TODO(synk): stream w2/w3 over a hidden-dim grid axis (or
        #             pltpu.emit_pipeline) instead of keeping all layers resident.
        raise ValueError(
            f"Resident weights need {w_bytes / 2**20:.1f} MiB VMEM "
            f"(budget {budget / 2**20:.1f} MiB); weight streaming not implemented.")

    def stream_bytes(t):
        # Double-buffered x/out tiles + f32 h1/h2 intermediates (compiler scratch).
        return 2 * t * (in_size + out_size) * 4 + 2 * t * hid * 4

    while tb > 16 and w_bytes + stream_bytes(tb) > budget:
        tb = max(16, _round_up(tb // 2, 16))
        if tb == 16:
            break
    return tb


def mlp_forward(x, w1, b1, w2, b2, w3, b3, *,
                block_batch=None,
                vmem_limit_bytes=None,
                out_dtype=jnp.float32):
    """Batch-tiled MLP forward.  Pass params from prepare_params().

    x stays in its HBM dtype/layout (no wrapper pad/cast); weights/biases are
    VMEM-resident across the batch grid; the output has the true logical shape.
    """
    batch, in_size = x.shape
    hid = w1.shape[1]
    out_size = w3.shape[1]

    vmem_cap = _vmem_capacity_bytes()
    if vmem_limit_bytes is None:
        vmem_limit_bytes = int(vmem_cap * 0.8)      # ~100 MiB on v5e/v6e, ~51 MiB on v7x
    if block_batch is None:
        block_batch = 512 if vmem_cap >= 96 * 1024 * 1024 else 256

    tb = _pick_batch_tile(batch, block_batch)
    tb = _fit_tb_to_vmem(tb, in_size, hid, out_size, w1.dtype.itemsize,
                         vmem_limit_bytes)
    grid = (pl.cdiv(batch, tb),)   # edge block (batch % tb != 0) is masked by Pallas

    def build(single_buffer_weights):
        res_kwargs = ({"pipeline_mode": pl.Buffered(1)}
                      if single_buffer_weights else {})
        resident = lambda shape: pl.BlockSpec(shape, lambda i: (0, 0), **res_kwargs)
        return pl.pallas_call(
            mlp_kernel,
            out_shape=jax.ShapeDtypeStruct((batch, out_size), out_dtype),
            grid_spec=pltpu.PrefetchScalarGridSpec(
                num_scalar_prefetch=0,
                grid=grid,
                in_specs=[
                    # x / out march over the batch (auto double-buffered DMAs).
                    pl.BlockSpec((tb, in_size), lambda i: (i, 0)),
                    resident(w1.shape), resident(b1.shape),
                    resident(w2.shape), resident(b2.shape),
                    resident(w3.shape), resident(b3.shape),
                ],
                out_specs=pl.BlockSpec((tb, out_size), lambda i: (i, 0)),
            ),
            compiler_params=pltpu.CompilerParams(
                dimension_semantics=("parallel",),   # batch tiles independent
                vmem_limit_bytes=vmem_limit_bytes,
            ),
        )

    try:
        return build(True)(x, w1, b1, w2, b2, w3, b3)
    except Exception:
        # Older builds may reject pipeline_mode=pl.Buffered(1); default
        # double-buffering is functionally identical (just 2x weight VMEM).
        return build(False)(x, w1, b1, w2, b2, w3, b3)


def init_params(key, input_size, hidden_size, output_size):
    # Deterministic init mimicking nn.Linear's uniform(-1/sqrt(fan_in), +).
    def linear(k, fan_in, fan_out):
        kw, kb = jax.random.split(k)
        bound = 1.0 / jnp.sqrt(fan_in)
        w = jax.random.uniform(kw, (fan_in, fan_out), jnp.float32, -bound, bound)
        b = jax.random.uniform(kb, (1, fan_out), jnp.float32, -bound, bound)
        return w, b

    k1, k2, k3 = jax.random.split(key, 3)
    w1, b1 = linear(k1, input_size, hidden_size)
    w2, b2 = linear(k2, hidden_size, hidden_size)
    w3, b3 = linear(k3, hidden_size, output_size)
    return w1, b1, w2, b2, w3, b3


def _reference(x, w1, b1, w2, b2, w3, b3, compute_dtype=jnp.bfloat16):
    # Plain-JAX reference with the same bf16-matmul / f32-accumulate recipe
    # (eval-mode dropout == identity).
    cast = lambda a: a.astype(compute_dtype)
    h = jnp.dot(cast(x), cast(w1), preferred_element_type=jnp.float32) + b1
    h = jnp.maximum(h, 0.0)
    h = jnp.dot(cast(h), cast(w2), preferred_element_type=jnp.float32) + b2
    h = jnp.maximum(h, 0.0)
    return jnp.dot(cast(h), cast(w3), preferred_element_type=jnp.float32) + b3


if __name__ == "__main__":
    input_size, hidden_size, output_size = 16, 32, 8
    batch = 40  # not a multiple of the batch tile -> exercises masked edge blocks

    key = jax.random.PRNGKey(0)
    kx, kp = jax.random.split(key)
    x = jax.random.normal(kx, (batch, input_size), dtype=jnp.float32)
    raw_params = init_params(kp, input_size, hidden_size, output_size)

    params = prepare_params(*raw_params)   # one-time cast/reshape, outside the call
    out = mlp_forward(x, *params)
    jax.block_until_ready(out)

    ref = _reference(x, *raw_params)
    assert out.shape == (batch, output_size), out.shape
    assert jnp.allclose(out, ref, atol=1e-3, rtol=1e-3), \
        float(jnp.max(jnp.abs(out - ref)))

    print("KERNEL_OK")
</pallas_src>

<mosaic_0001>
module attributes {stable_mosaic.version = 11 : i64} {
  func.func @mlp_kernel(%arg0: i32, %arg1: memref<32x16xf32, #tpu.memory_space<vmem>>, %arg2: memref<16x32xbf16, #tpu.memory_space<vmem>>, %arg3: memref<1x32xf32, #tpu.memory_space<vmem>>, %arg4: memref<32x32xbf16, #tpu.memory_space<vmem>>, %arg5: memref<1x32xf32, #tpu.memory_space<vmem>>, %arg6: memref<32x8xbf16, #tpu.memory_space<vmem>>, %arg7: memref<1x8xf32, #tpu.memory_space<vmem>>, %arg8: memref<32x8xf32, #tpu.memory_space<vmem>>) attributes {dimension_semantics = [#tpu.dimension_semantics<parallel>], iteration_bounds = array<i64: 2>, scalar_prefetch = 0 : i64, scratch_operands = 0 : i64, tpu.core_type = #tpu.core_type<tc>, window_params = [{transform_indices = @transform_0, window_bounds = array<i64: 32, 16>}, {pipeline_mode = #tpu.pipeline_mode<synchronous>, transform_indices = @transform_1, window_bounds = array<i64: 16, 32>}, {pipeline_mode = #tpu.pipeline_mode<synchronous>, transform_indices = @transform_2, window_bounds = array<i64: 1, 32>}, {pipeline_mode = #tpu.pipeline_mode<synchronous>, transform_indices = @transform_3, window_bounds = array<i64: 32, 32>}, {pipeline_mode = #tpu.pipeline_mode<synchronous>, transform_indices = @transform_4, window_bounds = array<i64: 1, 32>}, {pipeline_mode = #tpu.pipeline_mode<synchronous>, transform_indices = @transform_5, window_bounds = array<i64: 32, 8>}, {pipeline_mode = #tpu.pipeline_mode<synchronous>, transform_indices = @transform_6, window_bounds = array<i64: 1, 8>}, {transform_indices = @transform_7, window_bounds = array<i64: 32, 8>}]} {
    %c0 = arith.constant 0 : index
    %c0_0 = arith.constant 0 : index
    %0 = vector.load %arg1[%c0, %c0_0] : memref<32x16xf32, #tpu.memory_space<vmem>>, vector<32x16xf32>
    %1 = arith.truncf %0 : vector<32x16xf32> to vector<32x16xbf16>
    %c0_1 = arith.constant 0 : index
    %c0_2 = arith.constant 0 : index
    %2 = vector.load %arg2[%c0_1, %c0_2] : memref<16x32xbf16, #tpu.memory_space<vmem>>, vector<16x32xbf16>
    %cst = arith.constant dense<0.000000e+00> : vector<32x32xf32>
    %3 = tpu.matmul %1, %2, %cst {dimension_numbers = #tpu.dot_dimension_numbers<[1], [0], [0], [1], [0, 0, 1, 1], [], []>} : vector<32x16xbf16>, vector<16x32xbf16>, vector<32x32xf32> -> vector<32x32xf32>
    %c0_3 = arith.constant 0 : index
    %c0_4 = arith.constant 0 : index
    %4 = vector.load %arg3[%c0_3, %c0_4] : memref<1x32xf32, #tpu.memory_space<vmem>>, vector<1x32xf32>
    %5 = vector.broadcast %4 : vector<1x32xf32> to vector<32x32xf32>
    %6 = arith.addf %3, %5 : vector<32x32xf32>
    %cst_5 = arith.constant 0.000000e+00 : f32
    %7 = vector.broadcast %cst_5 : f32 to vector<32x32xf32>
    %8 = arith.maximumf %6, %7 : vector<32x32xf32>
    %9 = arith.truncf %8 : vector<32x32xf32> to vector<32x32xbf16>
    %c0_6 = arith.constant 0 : index
    %c0_7 = arith.constant 0 : index
    %10 = vector.load %arg4[%c0_6, %c0_7] : memref<32x32xbf16, #tpu.memory_space<vmem>>, vector<32x32xbf16>
    %cst_8 = arith.constant dense<0.000000e+00> : vector<32x32xf32>
    %11 = tpu.matmul %9, %10, %cst_8 {dimension_numbers = #tpu.dot_dimension_numbers<[1], [0], [0], [1], [0, 0, 1, 1], [], []>} : vector<32x32xbf16>, vector<32x32xbf16>, vector<32x32xf32> -> vector<32x32xf32>
    %c0_9 = arith.constant 0 : index
    %c0_10 = arith.constant 0 : index
    %12 = vector.load %arg5[%c0_9, %c0_10] : memref<1x32xf32, #tpu.memory_space<vmem>>, vector<1x32xf32>
    %13 = vector.broadcast %12 : vector<1x32xf32> to vector<32x32xf32>
    %14 = arith.addf %11, %13 : vector<32x32xf32>
    %cst_11 = arith.constant 0.000000e+00 : f32
    %15 = vector.broadcast %cst_11 : f32 to vector<32x32xf32>
    %16 = arith.maximumf %14, %15 : vector<32x32xf32>
    %17 = arith.truncf %16 : vector<32x32xf32> to vector<32x32xbf16>
    %c0_12 = arith.constant 0 : index
    %c0_13 = arith.constant 0 : index
    %18 = vector.load %arg6[%c0_12, %c0_13] : memref<32x8xbf16, #tpu.memory_space<vmem>>, vector<32x8xbf16>
    %cst_14 = arith.constant dense<0.000000e+00> : vector<32x8xf32>
    %19 = tpu.matmul %17, %18, %cst_14 {dimension_numbers = #tpu.dot_dimension_numbers<[1], [0], [0], [1], [0, 0, 1, 1], [], []>} : vector<32x32xbf16>, vector<32x8xbf16>, vector<32x8xf32> -> vector<32x8xf32>
    %c0_15 = arith.constant 0 : index
    %c0_16 = arith.constant 0 : index
    %20 = vector.load %arg7[%c0_15, %c0_16] : memref<1x8xf32, #tpu.memory_space<vmem>>, vector<1x8xf32>
    %21 = vector.broadcast %20 : vector<1x8xf32> to vector<32x8xf32>
    %22 = arith.addf %19, %21 : vector<32x8xf32>
    %c0_17 = arith.constant 0 : index
    %c0_18 = arith.constant 0 : index
    %23 = vector.load %arg8[%c0_17, %c0_18] : memref<32x8xf32, #tpu.memory_space<vmem>>, vector<32x8xf32>
    tpu.vector_store %arg8[%c0_17, %c0_18], %22 {strides = array<i32>} : memref<32x8xf32, #tpu.memory_space<vmem>>, vector<32x8xf32>,
    return
  }
  func.func @transform_0(%arg0: i32) -> (i32, i32) {
    %c0_i32 = arith.constant 0 : i32
    %c0_i32_0 = arith.constant 0 : i32
    return %arg0, %c0_i32 : i32, i32
  }
  func.func @transform_1(%arg0: i32) -> (i32, i32) {
    %c0_i32 = arith.constant 0 : i32
    %c0_i32_0 = arith.constant 0 : i32
    %c0_i32_1 = arith.constant 0 : i32
    return %c0_i32, %c0_i32_0 : i32, i32
  }
  func.func @transform_2(%arg0: i32) -> (i32, i32) {
    %c0_i32 = arith.constant 0 : i32
    %c0_i32_0 = arith.constant 0 : i32
    %c0_i32_1 = arith.constant 0 : i32
    return %c0_i32, %c0_i32_0 : i32, i32
  }
  func.func @transform_3(%arg0: i32) -> (i32, i32) {
    %c0_i32 = arith.constant 0 : i32
    %c0_i32_0 = arith.constant 0 : i32
    %c0_i32_1 = arith.constant 0 : i32
    return %c0_i32, %c0_i32_0 : i32, i32
  }
  func.func @transform_4(%arg0: i32) -> (i32, i32) {
    %c0_i32 = arith.constant 0 : i32
    %c0_i32_0 = arith.constant 0 : i32
    %c0_i32_1 = arith.constant 0 : i32
    return %c0_i32, %c0_i32_0 : i32, i32
  }
  func.func @transform_5(%arg0: i32) -> (i32, i32) {
    %c0_i32 = arith.constant 0 : i32
    %c0_i32_0 = arith.constant 0 : i32
    %c0_i32_1 = arith.constant 0 : i32
    return %c0_i32, %c0_i32_0 : i32, i32
  }
  func.func @transform_6(%arg0: i32) -> (i32, i32) {
    %c0_i32 = arith.constant 0 : i32
    %c0_i32_0 = arith.constant 0 : i32
    %c0_i32_1 = arith.constant 0 : i32
    return %c0_i32, %c0_i32_0 : i32, i32
  }
  func.func @transform_7(%arg0: i32) -> (i32, i32) {
    %c0_i32 = arith.constant 0 : i32
    %c0_i32_0 = arith.constant 0 : i32
    return %arg0, %c0_i32 : i32, i32
  }
}

module attributes {stable_mosaic.version = 11 : i64} {
  func.func @mlp_kernel(%arg0: i32, %arg1: memref<32x16xf32, #tpu.memory_space<vmem>>, %arg2: memref<16x32xbf16, #tpu.memory_space<vmem>>, %arg3: memref<1x32xf32, #tpu.memory_space<vmem>>, %arg4: memref<32x32xbf16, #tpu.memory_space<vmem>>, %arg5: memref<1x32xf32, #tpu.memory_space<vmem>>, %arg6: memref<32x8xbf16, #tpu.memory_space<vmem>>, %arg7: memref<1x8xf32, #tpu.memory_space<vmem>>, %arg8: memref<32x8xf32, #tpu.memory_space<vmem>>) attributes {dimension_semantics = [#tpu.dimension_semantics<parallel>], iteration_bounds = array<i64: 2>, scalar_prefetch = 0 : i64, scratch_operands = 0 : i64, tpu.core_type = #tpu.core_type<tc>, window_params = [{transform_indices = @transform_0, window_bounds = array<i64: 32, 16>}, {pipeline_mode = #tpu.pipeline_mode<synchronous>, transform_indices = @transform_1, window_bounds = array<i64: 16, 32>}, {pipeline_mode = #tpu.pipeline_mode<synchronous>, transform_indices = @transform_2, window_bounds = array<i64: 1, 32>}, {pipeline_mode = #tpu.pipeline_mode<synchronous>, transform_indices = @transform_3, window_bounds = array<i64: 32, 32>}, {pipeline_mode = #tpu.pipeline_mode<synchronous>, transform_indices = @transform_4, window_bounds = array<i64: 1, 32>}, {pipeline_mode = #tpu.pipeline_mode<synchronous>, transform_indices = @transform_5, window_bounds = array<i64: 32, 8>}, {pipeline_mode = #tpu.pipeline_mode<synchronous>, transform_indices = @transform_6, window_bounds = array<i64: 1, 8>}, {transform_indices = @transform_7, window_bounds = array<i64: 32, 8>}]} {
    %c0 = arith.constant 0 : index
    %c0_0 = arith.constant 0 : index
    %0 = vector.load %arg1[%c0, %c0_0] : memref<32x16xf32, #tpu.memory_space<vmem>>, vector<32x16xf32>
    %1 = arith.truncf %0 : vector<32x16xf32> to vector<32x16xbf16>
    %c0_1 = arith.constant 0 : index
    %c0_2 = arith.constant 0 : index
    %2 = vector.load %arg2[%c0_1, %c0_2] : memref<16x32xbf16, #tpu.memory_space<vmem>>, vector<16x32xbf16>
    %cst = arith.constant dense<0.000000e+00> : vector<32x32xf32>
    %3 = tpu.matmul %1, %2, %cst {dimension_numbers = #tpu.dot_dimension_numbers<[1], [0], [0], [1], [0, 0, 1, 1], [], []>} : vector<32x16xbf16>, vector<16x32xbf16>, vector<32x32xf32> -> vector<32x32xf32>
    %c0_3 = arith.constant 0 : index
    %c0_4 = arith.constant 0 : index
    %4 = vector.load %arg3[%c0_3, %c0_4] : memref<1x32xf32, #tpu.memory_space<vmem>>, vector<1x32xf32>
    %5 = vector.broadcast %4 : vector<1x32xf32> to vector<32x32xf32>
    %6 = arith.addf %3, %5 : vector<32x32xf32>
    %cst_5 = arith.constant 0.000000e+00 : f32
    %7 = vector.broadcast %cst_5 : f32 to vector<32x32xf32>
    %8 = arith.maximumf %6, %7 : vector<32x32xf32>
    %9 = arith.truncf %8 : vector<32x32xf32> to vector<32x32xbf16>
    %c0_6 = arith.constant 0 : index
    %c0_7 = arith.constant 0 : index
    %10 = vector.load %arg4[%c0_6, %c0_7] : memref<32x32xbf16, #tpu.memory_space<vmem>>, vector<32x32xbf16>
    %cst_8 = arith.constant dense<0.000000e+00> : vector<32x32xf32>
    %11 = tpu.matmul %9, %10, %cst_8 {dimension_numbers = #tpu.dot_dimension_numbers<[1], [0], [0], [1], [0, 0, 1, 1], [], []>} : vector<32x32xbf16>, vector<32x32xbf16>, vector<32x32xf32> -> vector<32x32xf32>
    %c0_9 = arith.constant 0 : index
    %c0_10 = arith.constant 0 : index
    %12 = vector.load %arg5[%c0_9, %c0_10] : memref<1x32xf32, #tpu.memory_space<vmem>>, vector<1x32xf32>
    %13 = vector.broadcast %12 : vector<1x32xf32> to vector<32x32xf32>
    %14 = arith.addf %11, %13 : vector<32x32xf32>
    %cst_11 = arith.constant 0.000000e+00 : f32
    %15 = vector.broadcast %cst_11 : f32 to vector<32x32xf32>
    %16 = arith.maximumf %14, %15 : vector<32x32xf32>
    %17 = arith.truncf %16 : vector<32x32xf32> to vector<32x32xbf16>
    %c0_12 = arith.constant 0 : index
    %c0_13 = arith.constant 0 : index
    %18 = vector.load %arg6[%c0_12, %c0_13] : memref<32x8xbf16, #tpu.memory_space<vmem>>, vector<32x8xbf16>
    %cst_14 = arith.constant dense<0.000000e+00> : vector<32x8xf32>
    %19 = tpu.matmul %17, %18, %cst_14 {dimension_numbers = #tpu.dot_dimension_numbers<[1], [0], [0], [1], [0, 0, 1, 1], [], []>} : vector<32x32xbf16>, vector<32x8xbf16>, vector<32x8xf32> -> vector<32x8xf32>
    %c0_15 = arith.constant 0 : index
    %c0_16 = arith.constant 0 : index
    %20 = vector.load %arg7[%c0_15, %c0_16] : memref<1x8xf32, #tpu.memory_space<vmem>>, vector<1x8xf32>
    %21 = vector.broadcast %20 : vector<1x8xf32> to vector<32x8xf32>
    %22 = arith.addf %19, %21 : vector<32x8xf32>
    %c0_17 = arith.constant 0 : index
    %c0_18 = arith.constant 0 : index
    %23 = vector.load %arg8[%c0_17, %c0_18] : memref<32x8xf32, #tpu.memory_space<vmem>>, vector<32x8xf32>
    tpu.vector_store %arg8[%c0_17, %c0_18], %22 {strides = array<i32>} : memref<32x8xf32, #tpu.memory_space<vmem>>, vector<32x8xf32>,
    return
  }
  func.func @transform_0(%arg0: i32) -> (i32, i32) {
    %c0_i32 = arith.constant 0 : i32
    %c0_i32_0 = arith.constant 0 : i32
    return %arg0, %c0_i32 : i32, i32
  }
  func.func @transform_1(%arg0: i32) -> (i32, i32) {
    %c0_i32 = arith.constant 0 : i32
    %c0_i32_0 = arith.constant 0 : i32
    %c0_i32_1 = arith.constant 0 : i32
    return %c0_i32, %c0_i32_0 : i32, i32
  }
  func.func @transform_2(%arg0: i32) -> (i32, i32) {
    %c0_i32 = arith.constant 0 : i32
    %c0_i32_0 = arith.constant 0 : i32
    %c0_i32_1 = arith.constant 0 : i32
    return %c0_i32, %c0_i32_0 : i32, i32
  }
  func.func @transform_3(%arg0: i32) -> (i32, i32) {
    %c0_i32 = arith.constant 0 : i32
    %c0_i32_0 = arith.constant 0 : i32
    %c0_i32_1 = arith.constant 0 : i32
    return %c0_i32, %c0_i32_0 : i32, i32
  }
  func.func @transform_4(%arg0: i32) -> (i32, i32) {
    %c0_i32 = arith.constant 0 : i32
    %c0_i32_0 = arith.constant 0 : i32
    %c0_i32_1 = arith.constant 0 : i32
    return %c0_i32, %c0_i32_0 : i32, i32
  }
  func.func @transform_5(%arg0: i32) -> (i32, i32) {
    %c0_i32 = arith.constant 0 : i32
    %c0_i32_0 = arith.constant 0 : i32
    %c0_i32_1 = arith.constant 0 : i32
    return %c0_i32, %c0_i32_0 : i32, i32
  }
  func.func @transform_6(%arg0: i32) -> (i32, i32) {
    %c0_i32 = arith.constant 0 : i32
    %c0_i32_0 = arith.constant 0 : i32
    %c0_i32_1 = arith.constant 0 : i32
    return %c0_i32, %c0_i32_0 : i32, i32
  }
  func.func @transform_7(%arg0: i32) -> (i32, i32) {
    %c0_i32 = arith.constant 0 : i32
    %c0_i32_0 = arith.constant 0 : i32
    return %arg0, %c0_i32 : i32, i32
  }
}

</mosaic_0001>

<bundles_post_ra>
// kernel: tpu_custom_call.1
= control target key start
LH: loop header
LB: loop body
LE: loop exit
PB: predicated region body
PF: predicated region fallthrough
CT: control target
= control target key end

     0   :  { %s960_s24 = smov 0   ;;  %s962_s25 = smov 0   ;;  %s1088_s0 = inlined_call_operand.vmem [shape: f32[40,16], index: 0, kind: input, shape index: {}]   ;;  %s1089_s1 = inlined_call_operand.vmem [shape: bf16[16,32], index: 1, kind: input, shape index: {}]   ;;  %s1090_s2 = inlined_call_operand.vmem [shape: f32[1,32], index: 2, kind: input, shape index: {}]   ;;  %s1091_s3 = inlined_call_operand.vmem [shape: bf16[32,32], index: 3, kind: input, shape index: {}]   ;;  %s1092_s4 = inlined_call_operand.vmem [shape: f32[1,32], index: 4, kind: input, shape index: {}]   ;;  %s1093_s5 = inlined_call_operand.vmem [shape: bf16[32,8], index: 5, kind: input, shape index: {}]   ;;  %s1094_s6 = inlined_call_operand.vmem [shape: f32[1,8], index: 6, kind: input, shape index: {}]   ;;  %s1095_s7 = inlined_call_operand.vmem [shape: f32[40,8], index: 7, kind: output, shape index: {}]  }
   0x1   :  { %s964_s26 = smov 0  }
   0x2 LB: > { %s973_s27 = sadd.s32 4294967295, %s886_s26   ;;  %s975_s28 = sadd.s32 1, %s886_s26   ;;  %s886_s26 = sphi %s964_s26, %s1102_s26   ;;  %s882_s25 = sphi %s962_s25, %s1101_s25   ;;  %s878_s24 = sphi %s960_s24, %s1100_s24  }
   0x3   : > { %s173_s29 = ssub.s32 %s886_s26, %s975_s28  ;;  %s176_s30 = sadd.s32 1, %s882_s25 }
   0x4   : > { %p174_p0 = scmp.eq.s32.totalorder %s173_s29, 0  ;;  %p186_p1 = scmp.ne.s32.totalorder %s882_s25, %s878_s24 }
   0x5   : > { %p187_p2 = scmp.eq.s32.totalorder %s973_s27, 1  ;;  %p684_p3 = scmp.ge.s32.totalorder %s886_s26, 1 }
   0x6   : > { %s983_s8 = scalar_select %p174_p0, %s882_s25, %s176_s30  }
   0x7   : > { %p985_p4 = por %p187_p2, %p186_p1  ;;  %p246_p5 = scmp.lt.s32.totalorder %s886_s26, 3 }
   0x9   : > { %p247_p6 = pnand %p684_p3, %p246_p5 }
   0xa   : > { %s993_s12 = sshll.u32 (!%p247_p6), %s973_s27, 2 }
   0xb   : > { %250 = sbr.rel (%p247_p6) target bundleno = 507 (0x1fb), region = 48  ;;  %p286_p7 = scmp.lt.s32.totalorder (!%p247_p6), %s993_s12, 4 }
  0x10   : > { %v731_v0 = vld [vmem:[%s1089_s1] sm:$0xff]  ;;  %s287_s13 = scalar_select %p286_p7, %s993_s12, 4  ;;  %vm319_vm0 = vcmask 130048   ;;  %v733_v7 = vld [vmem:[%s1091_s3 + $0x8] sm:$0xff]  ;;  %vm371_vm1 = vcmask 261120   ;;  %vm448_vm2 = vcmask 64512  }
  0x11   : > { %333 = vmatpush.bf16.msra.mxu0 %v731_v0  ;;  %384 = vmatpush.bf16.msra.mxu1 %v733_v7  ;;  %v732_v8 = vld [vmem:[%s1091_s3] sm:$0xff]  ;;  %v735_v24 = vld [vmem:[%s1093_s5 + $0x8] sm:$0xff]  ;;  %s736_s19 = sshll.u32 (%p985_p4), %s973_s27, 5 }
  0x12   : > { %s687_s14 = sshll.u32 %s287_s13, 3  ;;  %739 = vmatpush.bf16.msra.mxu3 %v733_v7  ;;  %v829_v10 = vld [vmem:[%s1090_s2] ss:$0 sm:$0xff]  ;;  %435 = vmatpush.bf16.msra.mxu2 %v735_v24  ;;  %s1039_s22 = scalar_lea.vmem (%p985_p4), %s1095_s7, %s736_s19  }
  0x13   : > { %s289_s17 = scalar_lea.vmem %s1088_s0, %s687_s14  ;;  %v734_v25 = vld [vmem:[%s1093_s5] sm:$0xff]  ;;  %s278_s14 = sand.u32 1, %s878_s24  }
  0x14   : > { %v301_v1 = vld [vmem:[%s289_s17] sm:$0xff]  ;;  %v302_v2 = vld [vmem:[%s289_s17 + $0x8] sm:$0xff]  ;;  %v303_v4 = vld [vmem:[%s289_s17 + $0x10] sm:$0xff]  ;;  %s685_s15 = sshll.u32 %s278_s14, 5  ;;  %s461_s24 = ssub.s32 (%p985_p4), 5, %s993_s12 }
  0x15   : > { %v305_v3 = vpack.c.bf16 %v302_v2, %v301_v1  ;;  %v304_v5 = vld [vmem:[%s289_s17 + $0x18] sm:$0xff]  ;;  %385 = vmatpush.bf16.msra.mxu1 %v732_v8  ;;  %v830_v27 = vld [vmem:[%s1092_s4] ss:$0 sm:$0xff]  ;;  %s1026_s18 = scalar_lea.vmem [#allocation2], %s685_s15   ;;  %p462_p8 = scmp.lt.s32.totalorder (%p985_p4), %s461_s24, 4 }
  0x16   : > { %v306_v6 = vpack.c.bf16 %v304_v5, %v303_v4  ;;  %740 = vmatpush.bf16.msra.mxu3 %v732_v8  ;;  %436 = vmatpush.bf16.msra.mxu2 %v734_v25  ;;  %v831_v41 = vld [vmem:[%s1094_s6] ss:$0 sm:$0xff] }
  0x17   : > { %692 = vmatmul.msk.bf16.vlgmr.msra.gmra.mxu0 %vm319_vm0, %v305_v3 }
  0x27   : > { %693 = vmatmul.msk.bf16.gmra.mxu0 %vm319_vm0, %v306_v6 }
  0x94   : > { %v335_v9 = vpop.f32.mrf.mxu0 }
  0x95   : > { %v336_v11 = vadd.f32 %v829_v10, %v335_v9 }
  0x97   : > { %v345_v14 = vmax.f32 %v336_v11, 0.0 }
  0x9c   : > { %v337_v12 = vpop.f32.mrf.mxu0 }
  0x9d   : > { %v338_v13 = vadd.f32 %v829_v10, %v337_v12 }
  0x9f   : > { %v346_v15 = vmax.f32 %v338_v13, 0.0 }
  0xa1   : > { %v349_v16 = vpack.c.bf16 %v346_v15, %v345_v14 }
  0xa3   : > { %702 = vmatmul.msk.bf16.vlgmr.msra.gmra.mxu1 %vm371_vm1, %v349_v16 }
  0xa4   : > { %v340_v17 = vpop.f32.mrf.mxu0 }
  0xa5   : > { %v341_v18 = vadd.f32 %v829_v10, %v340_v17 }
  0xa7   : > { %v347_v21 = vmax.f32 %v341_v18, 0.0 }
  0xac   : > { %v342_v19 = vpop.f32.mrf.mxu0 }
  0xad   : > { %v343_v20 = vadd.f32 %v829_v10, %v342_v19 }
  0xaf   : > { %v348_v22 = vmax.f32 %v343_v20, 0.0 }
  0xb1   : > { %v350_v23 = vpack.c.bf16 %v348_v22, %v347_v21 }
  0xb3   : > { %703 = vmatmul.msk.bf16.vlgmr.msra.gmra.mxu3 %vm371_vm1, %v350_v23 }
 0x120   : > { %v387_v26 = vpop.f32.mrf.mxu1 }
 0x121   : > { %v388_v28 = vadd.f32 %v830_v27, %v387_v26 }
 0x123   : > { %v397_v31 = vmax.f32 %v388_v28, 0.0 }
 0x128   : > { %v389_v29 = vpop.f32.mrf.mxu1 }
 0x129   : > { %v390_v30 = vadd.f32 %v830_v27, %v389_v29 }
 0x12b   : > { %v398_v32 = vmax.f32 %v390_v30, 0.0 }
 0x12d   : > { %v401_v33 = vpack.c.bf16 %v398_v32, %v397_v31 }
 0x12f   : > { %712 = vmatmul.msk.bf16.vlgmr.msra.gmra.mxu2 %vm371_vm1, %v401_v33 }
 0x136   : > { %v392_v34 = vpop.f32.mrf.mxu3 }
 0x137   : > { %v393_v35 = vadd.f32 %v830_v27, %v392_v34 }
 0x139   : > { %v399_v38 = vmax.f32 %v393_v35, 0.0 }
 0x13e   : > { %v394_v36 = vpop.f32.mrf.mxu3 }
 0x13f   : > { %v395_v37 = vadd.f32 %v830_v27, %v394_v36 }
 0x141   : > { %v400_v39 = vmax.f32 %v395_v37, 0.0 }
 0x143   : > { %v402_v40 = vpack.c.bf16 %v400_v39, %v399_v38 }
 0x145   : > { %713 = vmatmul.msk.bf16.gmra.mxu2 %vm371_vm1, %v402_v40 }
 0x1b2   : > { %v438_v42 = vpop.f32.mrf.mxu2 }
 0x1b3   : > { %v439_v43 = vadd.f32 %v831_v41, %v438_v42 }
 0x1b5   : > { %449 = vst.msk [vmem:[%s1026_s18] sm:$0xff] %vm448_vm2, %v439_v43 }
 0x1ba   : > { %v440_v44 = vpop.f32.mrf.mxu2 }
 0x1bb   : > { %v441_v45 = vadd.f32 %v831_v41, %v440_v44 }
 0x1bd   : > { %450 = vst.msk [vmem:[%s1026_s18 + $0x8] sm:$0xff] %vm448_vm2, %v441_v45 }
 0x1c8   : > { %v443_v46 = vpop.f32.mrf.mxu2 }
 0x1c9   : > { %v444_v47 = vadd.f32 %v831_v41, %v443_v46 }
 0x1cb   : > { %451 = vst.msk [vmem:[%s1026_s18 + $0x10] sm:$0xff] %vm448_vm2, %v444_v47 }
 0x1cf   : > { %459 = sbr.rel (!%p985_p4) target bundleno = 507 (0x1fb), region = 52 }
 0x1d0   : > { %v445_v48 = vpop.f32.mrf.mxu2 }
 0x1d1   : > { %v446_v49 = vadd.f32 %v831_v41, %v445_v48 }
 0x1d3   : > { %452 = vst.msk [vmem:[%s1026_s18 + $0x18] sm:$0xff] %vm448_vm2, %v446_v49 }
 0x1d4   : > { %s1104_s24 = smov (!%p462_p8, %s461_s24), 4 }
 0x1d5   : > { %s716_s23 = sshll.u32 %s1104_s24, 3 }
 0x1d6   : > { %p719_p9 = scmp.eq.s32.totalorder %s716_s23, 0 }
 0x1d7   : > { %s1045_s26 = sshrl.u32 (!%p719_p9), %s1104_s24, 2 }
 0x1d8   : > { %470 = sbr.rel (%p719_p9) target bundleno = 507 (0x1fb), region = 56  ;;  %p720_p10 = scmp.le.s32.totalorder (!%p719_p9), %s1045_s26, 0 }
 0x1dd   : > { %637 = sbr.rel (%p720_p10) target bundleno = 490 (0x1ea), region = 132  ;;  %s1097_s27 = smov (!%p720_p10), %s1039_s22 }
 0x1de   : > { %s1098_s9 = smov (!%p720_p10), %s1026_s18  ;;  %s1054_s12 = smov (!%p720_p10), 0  }
 0x1df   : > { %s900_s29 = smov (!%p720_p10), 0  }
 0x1e2 LB: >> { %v539_v50 = vld [vmem:[%s894_s9] sm:$0xff]  ;;  %v541_v51 = vld [vmem:[%s894_s9 + $0x8] sm:$0xff]  ;;  %v543_v52 = vld [vmem:[%s894_s9 + $0x10] sm:$0xff]  ;;  %s547_s30 = sadd.s32 1, %s898_s12  ;;  %s533_s29 = sadd.s32 1, %s902_s29   ;;  %s902_s29 = sphi %s900_s29, %s533_s29   ;;  %s898_s12 = sphi %s1054_s12, %s1099_s12   ;;  %s894_s9 = sphi %s1098_s9, %s552_s9   ;;  %s890_s27 = sphi %s1097_s27, %s553_s27  }
 0x1e3   : >> { %540 = vst [vmem:[%s890_s27] sm:$0xff] %v539_v50  ;;  %v545_v53 = vld [vmem:[%s894_s9 + $0x18] sm:$0xff]  ;;  %p548_p11 = scmp.ge.s32.totalorder %s547_s30, %s1045_s26  ;;  %p532_p12 = scmp.ge.s32.totalorder %s533_s29, %s1045_s26 }
 0x1e4   : >> { %542 = vst [vmem:[%s890_s27 + $0x8] sm:$0xff] %v541_v51 }
 0x1e5   : >> { %544 = vst [vmem:[%s890_s27 + $0x10] sm:$0xff] %v543_v52  ;;  %s1106_s30 = smov (%p548_p11, %s547_s30), 0  ;;  %535 = sbr.rel (!%p532_p12) target bundleno = 482 (0x1e2), region = 138 }
 0x1e6   : >> { %546 = vst [vmem:[%s890_s27 + $0x18] sm:$0xff] %v545_v53  ;;  %s721_s10 = sshll.u32 %s1106_s30, 5  ;;  %s1099_s12 = smov %s1106_s30 }
 0x1e7   : >> { %s552_s9 = scalar_lea.vmem %s1026_s18, %s721_s10 [#allocation2]   ;;  %s553_s27 = scalar_lea.vmem %s1039_s22, %s721_s10  }
 0x1ea PF: > { %s1070_s11 = sand.u32 3, %s1104_s24   ;;  %s737_s13 = sshll.u32 %s1045_s26, 5 }
 0x1eb   : > { %s558_s14 = scalar_lea.vmem %s1026_s18, %s737_s13 [#allocation2]   ;;  %s560_s15 = scalar_lea.vmem %s1039_s22, %s737_s13  }
 0x1ec   : > { %p726_p13 = scmp.le.s32.totalorder %s1070_s11, 0 }
 0x1ed   : > { %s904_s16 = smov (!%p726_p13), %s560_s15   ;;  %s908_s17 = smov (!%p726_p13), %s558_s14  }
 0x1ee   : > { %651 = sbr.rel (%p726_p13) target bundleno = 507 (0x1fb), region = 143  ;;  %s912_s19 = smov (!%p726_p13), 0  }
 0x1ef   : > { %s916_s20 = smov (!%p726_p13), 0  }
 0x1f3 LB: >> { %v570_v54 = vld [vmem:[%s910_s17] sm:$0xff]  ;;  %s572_s24 = sadd.s32 1, %s914_s19  ;;  %s564_s20 = sadd.s32 1, %s918_s20   ;;  %s918_s20 = sphi %s916_s20, %s564_s20   ;;  %s914_s19 = sphi %s912_s19, %s913_s19   ;;  %s910_s17 = sphi %s908_s17, %s577_s17   ;;  %s906_s16 = sphi %s904_s16, %s578_s16  }
 0x1f4   : >> { %571 = vst [vmem:[%s906_s16] sm:$0xff] %v570_v54  ;;  %p573_p0 = scmp.ge.s32.totalorder %s572_s24, %s1070_s11  ;;  %p563_p1 = scmp.ge.s32.totalorder %s564_s20, %s1070_s11 }
 0x1f6   : >> { %s1108_s24 = smov (%p573_p0, %s572_s24), 0  ;;  %566 = sbr.rel (!%p563_p1) target bundleno = 499 (0x1f3), region = 149 }
 0x1f7   : >> { %s727_s18 = sshll.u32 %s1108_s24, 3  ;;  %s913_s19 = smov %s1108_s24  }
 0x1f8   : >> { %s577_s17 = scalar_lea.vmem %s558_s14, %s727_s18 [#allocation2]   ;;  %s578_s16 = scalar_lea.vmem %s560_s15, %s727_s18  }
 0x1fb PF: > { %p14_p2 = scmp.ge.s32.totalorder %s975_s28, 4   ;;  %s1100_s24 = smov %s882_s25 }
 0x1fc   : > { %s1101_s25 = smov %s983_s8  ;;  %s1102_s26 = smov %s975_s28 }
 0x1fd   :  { %16 = sbr.rel (!%p14_p2) target bundleno = 2 (0x2), region = 160 }

// kernel: tpu_custom_call.1
= control target key start
LH: loop header
LB: loop body
LE: loop exit
PB: predicated region body
PF: predicated region fallthrough
CT: control target
= control target key end

     0   :  { %s960_s24 = smov 0   ;;  %s962_s25 = smov 0   ;;  %s1088_s0 = inlined_call_operand.vmem [shape: f32[40,16], index: 0, kind: input, shape index: {}]   ;;  %s1089_s1 = inlined_call_operand.vmem [shape: bf16[16,32], index: 1, kind: input, shape index: {}]   ;;  %s1090_s2 = inlined_call_operand.vmem [shape: f32[1,32], index: 2, kind: input, shape index: {}]   ;;  %s1091_s3 = inlined_call_operand.vmem [shape: bf16[32,32], index: 3, kind: input, shape index: {}]   ;;  %s1092_s4 = inlined_call_operand.vmem [shape: f32[1,32], index: 4, kind: input, shape index: {}]   ;;  %s1093_s5 = inlined_call_operand.vmem [shape: bf16[32,8], index: 5, kind: input, shape index: {}]   ;;  %s1094_s6 = inlined_call_operand.vmem [shape: f32[1,8], index: 6, kind: input, shape index: {}]   ;;  %s1095_s7 = inlined_call_operand.vmem [shape: f32[40,8], index: 7, kind: output, shape index: {}]  }
   0x1   :  { %s964_s26 = smov 0  }
   0x2 LB: > { %s973_s27 = sadd.s32 4294967295, %s886_s26   ;;  %s975_s28 = sadd.s32 1, %s886_s26   ;;  %s886_s26 = sphi %s964_s26, %s1102_s26   ;;  %s882_s25 = sphi %s962_s25, %s1101_s25   ;;  %s878_s24 = sphi %s960_s24, %s1100_s24  }
   0x3   : > { %s173_s29 = ssub.s32 %s886_s26, %s975_s28  ;;  %s176_s30 = sadd.s32 1, %s882_s25 }
   0x4   : > { %p174_p0 = scmp.eq.s32.totalorder %s173_s29, 0  ;;  %p186_p1 = scmp.ne.s32.totalorder %s882_s25, %s878_s24 }
   0x5   : > { %p187_p2 = scmp.eq.s32.totalorder %s973_s27, 1  ;;  %p684_p3 = scmp.ge.s32.totalorder %s886_s26, 1 }
   0x6   : > { %s983_s8 = scalar_select %p174_p0, %s882_s25, %s176_s30  }
   0x7   : > { %p985_p4 = por %p187_p2, %p186_p1  ;;  %p246_p5 = scmp.lt.s32.totalorder %s886_s26, 3 }
   0x9   : > { %p247_p6 = pnand %p684_p3, %p246_p5 }
   0xa   : > { %s993_s12 = sshll.u32 (!%p247_p6), %s973_s27, 2 }
   0xb   : > { %250 = sbr.rel (%p247_p6) target bundleno = 507 (0x1fb), region = 48  ;;  %p286_p7 = scmp.lt.s32.totalorder (!%p247_p6), %s993_s12, 4 }
  0x10   : > { %v731_v0 = vld [vmem:[%s1089_s1] sm:$0xff]  ;;  %s287_s13 = scalar_select %p286_p7, %s993_s12, 4  ;;  %vm319_vm0 = vcmask 130048   ;;  %v733_v7 = vld [vmem:[%s1091_s3 + $0x8] sm:$0xff]  ;;  %vm371_vm1 = vcmask 261120   ;;  %vm448_vm2 = vcmask 64512  }
  0x11   : > { %333 = vmatpush.bf16.msra.mxu0 %v731_v0  ;;  %384 = vmatpush.bf16.msra.mxu1 %v733_v7  ;;  %v732_v8 = vld [vmem:[%s1091_s3] sm:$0xff]  ;;  %v735_v24 = vld [vmem:[%s1093_s5 + $0x8] sm:$0xff]  ;;  %s736_s19 = sshll.u32 (%p985_p4), %s973_s27, 5 }
  0x12   : > { %s687_s14 = sshll.u32 %s287_s13, 3  ;;  %739 = vmatpush.bf16.msra.mxu3 %v733_v7  ;;  %v829_v10 = vld [vmem:[%s1090_s2] ss:$0 sm:$0xff]  ;;  %435 = vmatpush.bf16.msra.mxu2 %v735_v24  ;;  %s1039_s22 = scalar_lea.vmem (%p985_p4), %s1095_s7, %s736_s19  }
  0x13   : > { %s289_s17 = scalar_lea.vmem %s1088_s0, %s687_s14  ;;  %v734_v25 = vld [vmem:[%s1093_s5] sm:$0xff]  ;;  %s278_s14 = sand.u32 1, %s878_s24  }
  0x14   : > { %v301_v1 = vld [vmem:[%s289_s17] sm:$0xff]  ;;  %v302_v2 = vld [vmem:[%s289_s17 + $0x8] sm:$0xff]  ;;  %v303_v4 = vld [vmem:[%s289_s17 + $0x10] sm:$0xff]  ;;  %s685_s15 = sshll.u32 %s278_s14, 5  ;;  %s461_s24 = ssub.s32 (%p985_p4), 5, %s993_s12 }
  0x15   : > { %v305_v3 = vpack.c.bf16 %v302_v2, %v301_v1  ;;  %v304_v5 = vld [vmem:[%s289_s17 + $0x18] sm:$0xff]  ;;  %385 = vmatpush.bf16.msra.mxu1 %v732_v8  ;;  %v830_v27 = vld [vmem:[%s1092_s4] ss:$0 sm:$0xff]  ;;  %s1026_s18 = scalar_lea.vmem [#allocation2], %s685_s15   ;;  %p462_p8 = scmp.lt.s32.totalorder (%p985_p4), %s461_s24, 4 }
  0x16   : > { %v306_v6 = vpack.c.bf16 %v304_v5, %v303_v4  ;;  %740 = vmatpush.bf16.msra.mxu3 %v732_v8  ;;  %436 = vmatpush.bf16.msra.mxu2 %v734_v25  ;;  %v831_v41 = vld [vmem:[%s1094_s6] ss:$0 sm:$0xff] }
  0x17   : > { %692 = vmatmul.msk.bf16.vlgmr.msra.gmra.mxu0 %vm319_vm0, %v305_v3 }
  0x27   : > { %693 = vmatmul.msk.bf16.gmra.mxu0 %vm319_vm0, %v306_v6 }
  0x94   : > { %v335_v9 = vpop.f32.mrf.mxu0 }
  0x95   : > { %v336_v11 = vadd.f32 %v829_v10, %v335_v9 }
  0x97   : > { %v345_v14 = vmax.f32 %v336_v11, 0.0 }
  0x9c   : > { %v337_v12 = vpop.f32.mrf.mxu0 }
  0x9d   : > { %v338_v13 = vadd.f32 %v829_v10, %v337_v12 }
  0x9f   : > { %v346_v15 = vmax.f32 %v338_v13, 0.0 }
  0xa1   : > { %v349_v16 = vpack.c.bf16 %v346_v15, %v345_v14 }
  0xa3   : > { %702 = vmatmul.msk.bf16.vlgmr.msra.gmra.mxu1 %vm371_vm1, %v349_v16 }
  0xa4   : > { %v340_v17 = vpop.f32.mrf.mxu0 }
  0xa5   : > { %v341_v18 = vadd.f32 %v829_v10, %v340_v17 }
  0xa7   : > { %v347_v21 = vmax.f32 %v341_v18, 0.0 }
  0xac   : > { %v342_v19 = vpop.f32.mrf.mxu0 }
  0xad   : > { %v343_v20 = vadd.f32 %v829_v10, %v342_v19 }
  0xaf   : > { %v348_v22 = vmax.f32 %v343_v20, 0.0 }
  0xb1   : > { %v350_v23 = vpack.c.bf16 %v348_v22, %v347_v21 }
  0xb3   : > { %703 = vmatmul.msk.bf16.vlgmr.msra.gmra.mxu3 %vm371_vm1, %v350_v23 }
 0x120   : > { %v387_v26 = vpop.f32.mrf.mxu1 }
 0x121   : > { %v388_v28 = vadd.f32 %v830_v27, %v387_v26 }
 0x123   : > { %v397_v31 = vmax.f32 %v388_v28, 0.0 }
 0x128   : > { %v389_v29 = vpop.f32.mrf.mxu1 }
 0x129   : > { %v390_v30 = vadd.f32 %v830_v27, %v389_v29 }
 0x12b   : > { %v398_v32 = vmax.f32 %v390_v30, 0.0 }
 0x12d   : > { %v401_v33 = vpack.c.bf16 %v398_v32, %v397_v31 }
 0x12f   : > { %712 = vmatmul.msk.bf16.vlgmr.msra.gmra.mxu2 %vm371_vm1, %v401_v33 }
 0x136   : > { %v392_v34 = vpop.f32.mrf.mxu3 }
 0x137   : > { %v393_v35 = vadd.f32 %v830_v27, %v392_v34 }
 0x139   : > { %v399_v38 = vmax.f32 %v393_v35, 0.0 }
 0x13e   : > { %v394_v36 = vpop.f32.mrf.mxu3 }
 0x13f   : > { %v395_v37 = vadd.f32 %v830_v27, %v394_v36 }
 0x141   : > { %v400_v39 = vmax.f32 %v395_v37, 0.0 }
 0x143   : > { %v402_v40 = vpack.c.bf16 %v400_v39, %v399_v38 }
 0x145   : > { %713 = vmatmul.msk.bf16.gmra.mxu2 %vm371_vm1, %v402_v40 }
 0x1b2   : > { %v438_v42 = vpop.f32.mrf.mxu2 }
 0x1b3   : > { %v439_v43 = vadd.f32 %v831_v41, %v438_v42 }
 0x1b5   : > { %449 = vst.msk [vmem:[%s1026_s18] sm:$0xff] %vm448_vm2, %v439_v43 }
 0x1ba   : > { %v440_v44 = vpop.f32.mrf.mxu2 }
 0x1bb   : > { %v441_v45 = vadd.f32 %v831_v41, %v440_v44 }
 0x1bd   : > { %450 = vst.msk [vmem:[%s1026_s18 + $0x8] sm:$0xff] %vm448_vm2, %v441_v45 }
 0x1c8   : > { %v443_v46 = vpop.f32.mrf.mxu2 }
 0x1c9   : > { %v444_v47 = vadd.f32 %v831_v41, %v443_v46 }
 0x1cb   : > { %451 = vst.msk [vmem:[%s1026_s18 + $0x10] sm:$0xff] %vm448_vm2, %v444_v47 }
 0x1cf   : > { %459 = sbr.rel (!%p985_p4) target bundleno = 507 (0x1fb), region = 52 }
 0x1d0   : > { %v445_v48 = vpop.f32.mrf.mxu2 }
 0x1d1   : > { %v446_v49 = vadd.f32 %v831_v41, %v445_v48 }
 0x1d3   : > { %452 = vst.msk [vmem:[%s1026_s18 + $0x18] sm:$0xff] %vm448_vm2, %v446_v49 }
 0x1d4   : > { %s1104_s24 = smov (!%p462_p8, %s461_s24), 4 }
 0x1d5   : > { %s716_s23 = sshll.u32 %s1104_s24, 3 }
 0x1d6   : > { %p719_p9 = scmp.eq.s32.totalorder %s716_s23, 0 }
 0x1d7   : > { %s1045_s26 = sshrl.u32 (!%p719_p9), %s1104_s24, 2 }
 0x1d8   : > { %470 = sbr.rel (%p719_p9) target bundleno = 507 (0x1fb), region = 56  ;;  %p720_p10 = scmp.le.s32.totalorder (!%p719_p9), %s1045_s26, 0 }
 0x1dd   : > { %637 = sbr.rel (%p720_p10) target bundleno = 490 (0x1ea), region = 132  ;;  %s1097_s27 = smov (!%p720_p10), %s1039_s22 }
 0x1de   : > { %s1098_s9 = smov (!%p720_p10), %s1026_s18  ;;  %s1054_s12 = smov (!%p720_p10), 0  }
 0x1df   : > { %s900_s29 = smov (!%p720_p10), 0  }
 0x1e2 LB: >> { %v539_v50 = vld [vmem:[%s894_s9] sm:$0xff]  ;;  %v541_v51 = vld [vmem:[%s894_s9 + $0x8] sm:$0xff]  ;;  %v543_v52 = vld [vmem:[%s894_s9 + $0x10] sm:$0xff]  ;;  %s547_s30 = sadd.s32 1, %s898_s12  ;;  %s533_s29 = sadd.s32 1, %s902_s29   ;;  %s902_s29 = sphi %s900_s29, %s533_s29   ;;  %s898_s12 = sphi %s1054_s12, %s1099_s12   ;;  %s894_s9 = sphi %s1098_s9, %s552_s9   ;;  %s890_s27 = sphi %s1097_s27, %s553_s27  }
 0x1e3   : >> { %540 = vst [vmem:[%s890_s27] sm:$0xff] %v539_v50  ;;  %v545_v53 = vld [vmem:[%s894_s9 + $0x18] sm:$0xff]  ;;  %p548_p11 = scmp.ge.s32.totalorder %s547_s30, %s1045_s26  ;;  %p532_p12 = scmp.ge.s32.totalorder %s533_s29, %s1045_s26 }
 0x1e4   : >> { %542 = vst [vmem:[%s890_s27 + $0x8] sm:$0xff] %v541_v51 }
 0x1e5   : >> { %544 = vst [vmem:[%s890_s27 + $0x10] sm:$0xff] %v543_v52  ;;  %s1106_s30 = smov (%p548_p11, %s547_s30), 0  ;;  %535 = sbr.rel (!%p532_p12) target bundleno = 482 (0x1e2), region = 138 }
 0x1e6   : >> { %546 = vst [vmem:[%s890_s27 + $0x18] sm:$0xff] %v545_v53  ;;  %s721_s10 = sshll.u32 %s1106_s30, 5  ;;  %s1099_s12 = smov %s1106_s30 }
 0x1e7   : >> { %s552_s9 = scalar_lea.vmem %s1026_s18, %s721_s10 [#allocation2]   ;;  %s553_s27 = scalar_lea.vmem %s1039_s22, %s721_s10  }
 0x1ea PF: > { %s1070_s11 = sand.u32 3, %s1104_s24   ;;  %s737_s13 = sshll.u32 %s1045_s26, 5 }
 0x1eb   : > { %s558_s14 = scalar_lea.vmem %s1026_s18, %s737_s13 [#allocation2]   ;;  %s560_s15 = scalar_lea.vmem %s1039_s22, %s737_s13  }
 0x1ec   : > { %p726_p13 = scmp.le.s32.totalorder %s1070_s11, 0 }
 0x1ed   : > { %s904_s16 = smov (!%p726_p13), %s560_s15   ;;  %s908_s17 = smov (!%p726_p13), %s558_s14  }
 0x1ee   : > { %651 = sbr.rel (%p726_p13) target bundleno = 507 (0x1fb), region = 143  ;;  %s912_s19 = smov (!%p726_p13), 0  }
 0x1ef   : > { %s916_s20 = smov (!%p726_p13), 0  }
 0x1f3 LB: >> { %v570_v54 = vld [vmem:[%s910_s17] sm:$0xff]  ;;  %s572_s24 = sadd.s32 1, %s914_s19  ;;  %s564_s20 = sadd.s32 1, %s918_s20   ;;  %s918_s20 = sphi %s916_s20, %s564_s20   ;;  %s914_s19 = sphi %s912_s19, %s913_s19   ;;  %s910_s17 = sphi %s908_s17, %s577_s17   ;;  %s906_s16 = sphi %s904_s16, %s578_s16  }
 0x1f4   : >> { %571 = vst [vmem:[%s906_s16] sm:$0xff] %v570_v54  ;;  %p573_p0 = scmp.ge.s32.totalorder %s572_s24, %s1070_s11  ;;  %p563_p1 = scmp.ge.s32.totalorder %s564_s20, %s1070_s11 }
 0x1f6   : >> { %s1108_s24 = smov (%p573_p0, %s572_s24), 0  ;;  %566 = sbr.rel (!%p563_p1) target bundleno = 499 (0x1f3), region = 149 }
 0x1f7   : >> { %s727_s18 = sshll.u32 %s1108_s24, 3  ;;  %s913_s19 = smov %s1108_s24  }
 0x1f8   : >> { %s577_s17 = scalar_lea.vmem %s558_s14, %s727_s18 [#allocation2]   ;;  %s578_s16 = scalar_lea.vmem %s560_s15, %s727_s18  }
 0x1fb PF: > { %p14_p2 = scmp.ge.s32.totalorder %s975_s28, 4   ;;  %s1100_s24 = smov %s882_s25 }
 0x1fc   : > { %s1101_s25 = smov %s983_s8  ;;  %s1102_s26 = smov %s975_s28 }
 0x1fd   :  { %16 = sbr.rel (!%p14_p2) target bundleno = 2 (0x2), region = 160 }

</bundles_post_ra>
